<compile_context>
chip_gen: v7x
topology: tpu7x:2x2x1
jax: 0.10.0
libtpu: 0.0.40
codegen_flags: <defaults>
</compile_context>

<pallas_src>
import numpy as np
import jax
import jax.numpy as jnp
from jax.experimental import pallas as pl
from jax.experimental.pallas import tpu as pltpu  # noqa: F401  (TPU backend)

# ----------------------------- model dims -----------------------------------
B = 2        # batch
L = 16       # token sequence length
H = 32       # hidden size
W = 8        # max number of words
K = 4        # max span width
C = 4        # number of entity classes
F = 64       # FFN inner size
VOCAB = 128  # synthetic vocab
P = 128      # lane width: padded per-projection / padded class dim


# ----------------------------- fused Pallas kernel ----------------------------


def gliner_fused_kernel(emb_ref, mask_ref, oh_ref, soh_ref, eoh_ref,
                        wqkv_ref, wo_ref, w1_ref, w2_ref,
                        wss_ref, wse_ref, bspan_ref, clsp_ref, o_ref):
    """Encoder + word pooling + span gather + span scoring, single invocation."""
    x = emb_ref[...]                                  # [B, L, H]
    x2 = x.reshape(B * L, H)                          # fold batch into rows

    # fused lane-dense QKV projection: [B*L, 3*P]; each P-block holds one
    # projection in its first H lanes, zeros elsewhere.
    qkv = jnp.dot(x2, wqkv_ref[...],
                  preferred_element_type=jnp.float32).reshape(B, L, 3 * P)
    q = qkv[:, :, 0 * P:1 * P]                        # vreg-aligned slices
    k = qkv[:, :, 1 * P:2 * P]
    v = qkv[:, :, 2 * P:3 * P]

    scale = jnp.float32(1.0 / np.sqrt(H))
    # contracted-last-dim einsum: MXU consumes k directly (no transpose);
    # the zero-padded lanes contribute nothing to the contraction.
    scores = jnp.einsum("blp,bmp->blm", q, k,
                        preferred_element_type=jnp.float32) * scale  # [B, L, L]
    scores = jnp.where(mask_ref[...] > 0.0, scores, jnp.float32(-1e9))
    scores = scores - jnp.max(scores, axis=-1, keepdims=True)
    p = jnp.exp(scores)
    p = p * pl.reciprocal(jnp.sum(p, axis=-1, keepdims=True), approx=True)

    attn = jnp.einsum("blm,bmp->blp", p, v,
                      preferred_element_type=jnp.float32).reshape(B * L, P)
    h = x2 + jnp.dot(attn, wo_ref[...], preferred_element_type=jnp.float32)

    mu = jnp.mean(h, axis=-1, keepdims=True)
    var = jnp.mean((h - mu) ** 2, axis=-1, keepdims=True)
    h = (h - mu) * jax.lax.rsqrt(var + 1e-5)

    ff = jnp.maximum(jnp.dot(h, w1_ref[...], preferred_element_type=jnp.float32), 0.0)
    h2 = h + jnp.dot(ff, w2_ref[...], preferred_element_type=jnp.float32)
    mu2 = jnp.mean(h2, axis=-1, keepdims=True)
    var2 = jnp.mean((h2 - mu2) ** 2, axis=-1, keepdims=True)
    h2 = ((h2 - mu2) * jax.lax.rsqrt(var2 + 1e-5)).reshape(B, L, H)

    # word pooling: masked mean of sub-token reps per word (one-hot matmul)
    oh = oh_ref[...]                                  # [B, W, L]
    cnt = jnp.maximum(jnp.sum(oh, axis=-1, keepdims=True), 1.0)
    wrep = jnp.einsum("bwl,bld->bwd", oh, h2,
                      preferred_element_type=jnp.float32)
    wrep = wrep * pl.reciprocal(cnt, approx=True)     # [B, W, H]

    # span start/end gathers expressed as one-hot matmuls (stay on the MXU,
    # no HBM round-trip / JAX-side take_along_axis between kernels)
    srep = jnp.einsum("bsw,bwd->bsd", soh_ref[...], wrep,
                      preferred_element_type=jnp.float32).reshape(B * W * K, H)
    erep = jnp.einsum("bsw,bwd->bsd", eoh_ref[...], wrep,
                      preferred_element_type=jnp.float32).reshape(B * W * K, H)

    # span MLP: [srep | erep] @ W_span + b == srep @ W_top + erep @ W_bot + b
    hs = (jnp.dot(srep, wss_ref[...], preferred_element_type=jnp.float32)
          + jnp.dot(erep, wse_ref[...], preferred_element_type=jnp.float32)
          + bspan_ref[...])
    hs = jnp.maximum(hs, 0.0)

    # lane-dense class scoring: class prototypes padded to the full 128 lanes
    o_ref[...] = jnp.dot(hs, clsp_ref[...], preferred_element_type=jnp.float32)


# ----------------------------- JAX glue helpers --------------------------------


def _prep_glue(params, input_ids, attention_mask, words_mask):
    emb = jnp.take(params["tok_emb"], input_ids, axis=0)               # [B, L, H]
    mask3 = attention_mask.astype(jnp.float32)[:, None, :]             # [B, 1, L]
    wid = jnp.arange(1, W + 1, dtype=words_mask.dtype)[None, :, None]  # [1, W, 1]
    onehot = (words_mask[:, None, :] == wid).astype(jnp.float32)       # [B, W, L]
    return emb, mask3, onehot


def _span_onehots(span_idx):
    widx = jnp.arange(W, dtype=span_idx.dtype)[None, None, :]          # [1, 1, W]
    soh = (span_idx[..., 0][..., None] == widx).astype(jnp.float32)    # [B, W*K, W]
    eoh = (span_idx[..., 1][..., None] == widx).astype(jnp.float32)    # [B, W*K, W]
    return soh, eoh


def _span_features(wrep, span_idx):
    start = span_idx[..., 0]
    end = span_idx[..., 1]
    srep = jnp.take_along_axis(wrep, start[..., None], axis=1)
    erep = jnp.take_along_axis(wrep, end[..., None], axis=1)
    return jnp.concatenate([srep, erep], axis=-1)


def _final_mask(span_idx, span_mask, text_lengths):
    valid = (span_idx[..., 1] < text_lengths).astype(span_mask.dtype)
    return (span_mask * valid).reshape(B, W, K, 1)


# ----------------------------- full forward (Pallas) ---------------------------


@jax.jit
def gliner_forward(params, input_ids, attention_mask, words_mask,
                   text_lengths, span_idx, span_mask):
    emb, mask3, onehot = _prep_glue(params, input_ids, attention_mask, words_mask)
    soh, eoh = _span_onehots(span_idx)

    # pack/pad weights: each projection padded to a full 128-lane block
    def pad_lanes(w):
        return jnp.pad(w, ((0, 0), (0, P - H)))
    wqkv = jnp.concatenate([pad_lanes(params["wq"]),
                            pad_lanes(params["wk"]),
                            pad_lanes(params["wv"])], axis=1)          # [H, 3P]
    wo_pad = jnp.pad(params["wo"], ((0, P - H), (0, 0)))               # [P, H]
    cls_pad = jnp.pad(params["cls_t"], ((0, 0), (0, P - C)))           # [H, P]
    w_span_s = params["w_span"][:H]                                    # [H, H]
    w_span_e = params["w_span"][H:]                                    # [H, H]

    logits_pad = pl.pallas_call(
        gliner_fused_kernel,
        out_shape=jax.ShapeDtypeStruct((B * W * K, P), jnp.float32),
    )(emb, mask3, onehot, soh, eoh,
      wqkv, wo_pad, params["w1"], params["w2"],
      w_span_s, w_span_e, params["b_span"], cls_pad)

    logits = logits_pad[:, :C].reshape(B, W, K, C)
    mask = _final_mask(span_idx, span_mask, text_lengths)
    return jnp.where(mask > 0, logits, jnp.float32(-1e4))


# ----------------------------- pure-JAX reference ------------------------------


def _layernorm(x, eps=1e-5):
    mu = jnp.mean(x, axis=-1, keepdims=True)
    var = jnp.mean((x - mu) ** 2, axis=-1, keepdims=True)
    return (x - mu) * jax.lax.rsqrt(var + eps)


def reference_forward(params, input_ids, attention_mask, words_mask,
                      text_lengths, span_idx, span_mask):
    emb, mask3, onehot = _prep_glue(params, input_ids, attention_mask, words_mask)
    q = emb @ params["wq"]
    k = emb @ params["wk"]
    v = emb @ params["wv"]
    scores = jnp.einsum("bld,bmd->blm", q, k) / jnp.sqrt(jnp.float32(H))
    scores = jnp.where(mask3 > 0.0, scores, jnp.float32(-1e9))
    p = jax.nn.softmax(scores, axis=-1)
    attn = jnp.einsum("blm,bmd->bld", p, v)
    h = _layernorm(emb + attn @ params["wo"])
    h2 = _layernorm(h + jax.nn.relu(h @ params["w1"]) @ params["w2"])
    cnt = jnp.maximum(onehot.sum(-1, keepdims=True), 1.0)
    wrep = jnp.einsum("bwl,bld->bwd", onehot, h2) / cnt
    feat = _span_features(wrep, span_idx)
    hs = jax.nn.relu(feat @ params["w_span"] + params["b_span"][0])
    logits = (hs @ params["cls_t"]).reshape(B, W, K, C)
    mask = _final_mask(span_idx, span_mask, text_lengths)
    return jnp.where(mask > 0, logits, jnp.float32(-1e4))


# ----------------------------- params & inputs --------------------------------


def init_params(key):
    ks = jax.random.split(key, 9)
    s = 1.0 / np.sqrt(H)
    return {
        "tok_emb": jax.random.normal(ks[0], (VOCAB, H), jnp.float32) * 0.1,
        "wq": jax.random.normal(ks[1], (H, H), jnp.float32) * s,
        "wk": jax.random.normal(ks[2], (H, H), jnp.float32) * s,
        "wv": jax.random.normal(ks[3], (H, H), jnp.float32) * s,
        "wo": jax.random.normal(ks[4], (H, H), jnp.float32) * s,
        "w1": jax.random.normal(ks[5], (H, F), jnp.float32) * s,
        "w2": jax.random.normal(ks[6], (F, H), jnp.float32) * (1.0 / np.sqrt(F)),
        "w_span": jax.random.normal(ks[7], (2 * H, H), jnp.float32) * (1.0 / np.sqrt(2 * H)),
        "b_span": jnp.zeros((1, H), jnp.float32),
        "cls_t": jax.random.normal(ks[8], (H, C), jnp.float32) * s,  # class prototypes^T
    }


def build_inputs(key):
    input_ids = jax.random.randint(key, (B, L), 0, VOCAB, dtype=jnp.int32)

    attention_mask = np.ones((B, L), np.int32)
    attention_mask[1, -3:] = 0

    # words_mask: token 0 = [CLS] -> 0, tokens 1..n_words -> word ids 1..n_words
    text_len = np.array([[W], [W - 2]], np.int32)           # words per example
    words_mask = np.zeros((B, L), np.int32)
    for b in range(B):
        for w in range(int(text_len[b, 0])):
            words_mask[b, w + 1] = w + 1

    span_idx = np.zeros((B, W * K, 2), np.int32)
    span_mask = np.zeros((B, W * K), np.int32)
    for b in range(B):
        for w in range(W):
            for k in range(K):
                i = w * K + k
                span_idx[b, i, 0] = w
                span_idx[b, i, 1] = min(w + k, W - 1)
                span_mask[b, i] = 1 if (w + k) < int(text_len[b, 0]) else 0

    return (input_ids, jnp.asarray(attention_mask), jnp.asarray(words_mask),
            jnp.asarray(text_len), jnp.asarray(span_idx), jnp.asarray(span_mask))


# TODO(synk): the real GLiNER core (pretrained DeBERTa encoder + checkpointed
# span-rep / prompt-rep weights) is replaced by this deterministic synthetic
# single-layer encoder; no .pt/.pth files are loaded.

if __name__ == "__main__":
    root = jax.random.PRNGKey(0)
    pkey, ikey = jax.random.split(root)

    params = init_params(pkey)
    inputs = build_inputs(ikey)

    logits = gliner_forward(params, *inputs)
    jax.block_until_ready(logits)

    ref = reference_forward(params, *inputs)
    jax.block_until_ready(ref)

    assert logits.shape == (B, W, K, C), logits.shape
    assert bool(jnp.all(jnp.isfinite(logits)))
    np.testing.assert_allclose(np.asarray(logits), np.asarray(ref),
                               rtol=2e-2, atol=2e-2)
    print("KERNEL_OK")
</pallas_src>

<mosaic_0001>
module attributes {stable_mosaic.version = 11 : i64} {
  func.func @gliner_fused_kernel(%arg0: memref<2x16x32xf32, #tpu.memory_space<vmem>>, %arg1: memref<2x1x16xf32, #tpu.memory_space<vmem>>, %arg2: memref<2x8x16xf32, #tpu.memory_space<vmem>>, %arg3: memref<2x32x8xf32, #tpu.memory_space<vmem>>, %arg4: memref<2x32x8xf32, #tpu.memory_space<vmem>>, %arg5: memref<32x384xf32, #tpu.memory_space<vmem>>, %arg6: memref<128x32xf32, #tpu.memory_space<vmem>>, %arg7: memref<32x64xf32, #tpu.memory_space<vmem>>, %arg8: memref<64x32xf32, #tpu.memory_space<vmem>>, %arg9: memref<32x32xf32, #tpu.memory_space<vmem>>, %arg10: memref<32x32xf32, #tpu.memory_space<vmem>>, %arg11: memref<1x32xf32, #tpu.memory_space<vmem>>, %arg12: memref<32x128xf32, #tpu.memory_space<vmem>>, %arg13: memref<64x128xf32, #tpu.memory_space<vmem>>) attributes {dimension_semantics = [], scalar_prefetch = 0 : i64, scratch_operands = 0 : i64, tpu.core_type = #tpu.core_type<tc>} {
    %c0 = arith.constant 0 : index
    %c0_0 = arith.constant 0 : index
    %c0_1 = arith.constant 0 : index
    %0 = vector.load %arg0[%c0, %c0_0, %c0_1] : memref<2x16x32xf32, #tpu.memory_space<vmem>>, vector<2x16x32xf32>
    %1 = vector.shape_cast %0 : vector<2x16x32xf32> to vector<32x32xf32>
    %c0_2 = arith.constant 0 : index
    %c0_3 = arith.constant 0 : index
    %2 = vector.load %arg5[%c0_2, %c0_3] : memref<32x384xf32, #tpu.memory_space<vmem>>, vector<32x384xf32>
    %cst = arith.constant dense<0.000000e+00> : vector<32x384xf32>
    %3 = tpu.matmul %1, %2, %cst {dimension_numbers = #tpu.dot_dimension_numbers<[1], [0], [0], [1], [0, 0, 1, 1], [], []>} : vector<32x32xf32>, vector<32x384xf32>, vector<32x384xf32> -> vector<32x384xf32>
    %4 = vector.shape_cast %3 : vector<32x384xf32> to vector<2x16x384xf32>
    %5 = vector.extract_strided_slice %4 {offsets = [0, 0, 0], sizes = [2, 16, 128], strides = [1, 1, 1]} : vector<2x16x384xf32> to vector<2x16x128xf32>
    %6 = vector.extract_strided_slice %4 {offsets = [0, 0, 128], sizes = [2, 16, 128], strides = [1, 1, 1]} : vector<2x16x384xf32> to vector<2x16x128xf32>
    %7 = vector.extract_strided_slice %4 {offsets = [0, 0, 256], sizes = [2, 16, 128], strides = [1, 1, 1]} : vector<2x16x384xf32> to vector<2x16x128xf32>
    "tpu.trace_start"() <{level = 10 : i32, message = "blp,bmp->blm"}> : () -> ()
    %cst_4 = arith.constant dense<0.000000e+00> : vector<2x16x16xf32>
    %8 = tpu.matmul %5, %6, %cst_4 {dimension_numbers = #tpu.dot_dimension_numbers<[2], [2], [1], [1], [0, 0, 0, 1, 1, 1], [0], [0]>} : vector<2x16x128xf32>, vector<2x16x128xf32>, vector<2x16x16xf32> -> vector<2x16x16xf32>
    "tpu.trace_stop"() : () -> ()
    %cst_5 = arith.constant 0.176776692 : f32
    %9 = vector.broadcast %cst_5 : f32 to vector<2x16x16xf32>
    %10 = arith.mulf %8, %9 : vector<2x16x16xf32>
    %c0_6 = arith.constant 0 : index
    %c0_7 = arith.constant 0 : index
    %c0_8 = arith.constant 0 : index
    %11 = vector.load %arg1[%c0_6, %c0_7, %c0_8] : memref<2x1x16xf32, #tpu.memory_space<vmem>>, vector<2x1x16xf32>
    %cst_9 = arith.constant 0.000000e+00 : f32
    %12 = vector.broadcast %cst_9 : f32 to vector<2x1x16xf32>
    %13 = arith.cmpf ogt, %11, %12 : vector<2x1x16xf32>
    %cst_10 = arith.constant -1.000000e+09 : f32
    %14 = vector.shape_cast %13 : vector<2x1x16xi1> to vector<2x1x16xi1>
    %15 = vector.broadcast %14 : vector<2x1x16xi1> to vector<2x16x16xi1>
    %16 = vector.broadcast %cst_10 : f32 to vector<2x16x16xf32>
    %17 = arith.select %15, %10, %16 : vector<2x16x16xi1>, vector<2x16x16xf32>
    %cst_11 = arith.constant dense<0xFF800000> : vector<2x16xf32>
    %18 = vector.multi_reduction <maximumf>, %17, %cst_11 [2] : vector<2x16x16xf32> to vector<2x16xf32>
    %19 = vector.shape_cast %18 : vector<2x16xf32> to vector<2x16x1xf32>
    %20 = vector.broadcast %19 : vector<2x16x1xf32> to vector<2x16x16xf32>
    %21 = arith.subf %17, %20 : vector<2x16x16xf32>
    %22 = math.exp %21 : vector<2x16x16xf32>
    %cst_12 = arith.constant dense<0.000000e+00> : vector<2x16xf32>
    %23 = vector.multi_reduction <add>, %22, %cst_12 [2] : vector<2x16x16xf32> to vector<2x16xf32>
    %24 = vector.shape_cast %23 : vector<2x16xf32> to vector<2x16x1xf32>
    %25 = tpu.reciprocal %24 {approx = true} : vector<2x16x1xf32> -> vector<2x16x1xf32>
    %26 = vector.broadcast %25 : vector<2x16x1xf32> to vector<2x16x16xf32>
    %27 = arith.mulf %22, %26 : vector<2x16x16xf32>
    "tpu.trace_start"() <{level = 10 : i32, message = "blm,bmp->blp"}> : () -> ()
    %cst_13 = arith.constant dense<0.000000e+00> : vector<2x16x128xf32>
    %28 = tpu.matmul %27, %7, %cst_13 {dimension_numbers = #tpu.dot_dimension_numbers<[2], [1], [1], [2], [0, 0, 0, 1, 1, 2], [0], [0]>} : vector<2x16x16xf32>, vector<2x16x128xf32>, vector<2x16x128xf32> -> vector<2x16x128xf32>
    "tpu.trace_stop"() : () -> ()
    %29 = vector.shape_cast %28 : vector<2x16x128xf32> to vector<32x128xf32>
    %c0_14 = arith.constant 0 : index
    %c0_15 = arith.constant 0 : index
    %30 = vector.load %arg6[%c0_14, %c0_15] : memref<128x32xf32, #tpu.memory_space<vmem>>, vector<128x32xf32>
    %cst_16 = arith.constant dense<0.000000e+00> : vector<32x32xf32>
    %31 = tpu.matmul %29, %30, %cst_16 {dimension_numbers = #tpu.dot_dimension_numbers<[1], [0], [0], [1], [0, 0, 1, 1], [], []>} : vector<32x128xf32>, vector<128x32xf32>, vector<32x32xf32> -> vector<32x32xf32>
    %32 = arith.addf %1, %31 : vector<32x32xf32>
    %cst_17 = arith.constant dense<0.000000e+00> : vector<32xf32>
    %33 = vector.multi_reduction <add>, %32, %cst_17 [1] : vector<32x32xf32> to vector<32xf32>
    %34 = vector.shape_cast %33 : vector<32xf32> to vector<32x1xf32>
    %cst_18 = arith.constant 3.200000e+01 : f32
    %35 = vector.broadcast %cst_18 : f32 to vector<32x1xf32>
    %36 = arith.divf %34, %35 : vector<32x1xf32>
    %37 = vector.broadcast %36 : vector<32x1xf32> to vector<32x32xf32>
    %38 = arith.subf %32, %37 : vector<32x32xf32>
    %39 = arith.mulf %38, %38 : vector<32x32xf32>
    %cst_19 = arith.constant dense<0.000000e+00> : vector<32xf32>
    %40 = vector.multi_reduction <add>, %39, %cst_19 [1] : vector<32x32xf32> to vector<32xf32>
    %41 = vector.shape_cast %40 : vector<32xf32> to vector<32x1xf32>
    %cst_20 = arith.constant 3.200000e+01 : f32
    %42 = vector.broadcast %cst_20 : f32 to vector<32x1xf32>
    %43 = arith.divf %41, %42 : vector<32x1xf32>
    %44 = vector.broadcast %36 : vector<32x1xf32> to vector<32x32xf32>
    %45 = arith.subf %32, %44 : vector<32x32xf32>
    %cst_21 = arith.constant 9.99999974E-6 : f32
    %46 = vector.broadcast %cst_21 : f32 to vector<32x1xf32>
    %47 = arith.addf %43, %46 : vector<32x1xf32>
    %48 = math.rsqrt %47 : vector<32x1xf32>
    %49 = vector.broadcast %48 : vector<32x1xf32> to vector<32x32xf32>
    %50 = arith.mulf %45, %49 : vector<32x32xf32>
    %c0_22 = arith.constant 0 : index
    %c0_23 = arith.constant 0 : index
    %51 = vector.load %arg7[%c0_22, %c0_23] : memref<32x64xf32, #tpu.memory_space<vmem>>, vector<32x64xf32>
    %cst_24 = arith.constant dense<0.000000e+00> : vector<32x64xf32>
    %52 = tpu.matmul %50, %51, %cst_24 {dimension_numbers = #tpu.dot_dimension_numbers<[1], [0], [0], [1], [0, 0, 1, 1], [], []>} : vector<32x32xf32>, vector<32x64xf32>, vector<32x64xf32> -> vector<32x64xf32>
    %cst_25 = arith.constant 0.000000e+00 : f32
    %53 = vector.broadcast %cst_25 : f32 to vector<32x64xf32>
    %54 = arith.maximumf %52, %53 : vector<32x64xf32>
    %c0_26 = arith.constant 0 : index
    %c0_27 = arith.constant 0 : index
    %55 = vector.load %arg8[%c0_26, %c0_27] : memref<64x32xf32, #tpu.memory_space<vmem>>, vector<64x32xf32>
    %cst_28 = arith.constant dense<0.000000e+00> : vector<32x32xf32>
    %56 = tpu.matmul %54, %55, %cst_28 {dimension_numbers = #tpu.dot_dimension_numbers<[1], [0], [0], [1], [0, 0, 1, 1], [], []>} : vector<32x64xf32>, vector<64x32xf32>, vector<32x32xf32> -> vector<32x32xf32>
    %57 = arith.addf %50, %56 : vector<32x32xf32>
    %cst_29 = arith.constant dense<0.000000e+00> : vector<32xf32>
    %58 = vector.multi_reduction <add>, %57, %cst_29 [1] : vector<32x32xf32> to vector<32xf32>
    %59 = vector.shape_cast %58 : vector<32xf32> to vector<32x1xf32>
    %cst_30 = arith.constant 3.200000e+01 : f32
    %60 = vector.broadcast %cst_30 : f32 to vector<32x1xf32>
    %61 = arith.divf %59, %60 : vector<32x1xf32>
    %62 = vector.broadcast %61 : vector<32x1xf32> to vector<32x32xf32>
    %63 = arith.subf %57, %62 : vector<32x32xf32>
    %64 = arith.mulf %63, %63 : vector<32x32xf32>
    %cst_31 = arith.constant dense<0.000000e+00> : vector<32xf32>
    %65 = vector.multi_reduction <add>, %64, %cst_31 [1] : vector<32x32xf32> to vector<32xf32>
    %66 = vector.shape_cast %65 : vector<32xf32> to vector<32x1xf32>
    %cst_32 = arith.constant 3.200000e+01 : f32
    %67 = vector.broadcast %cst_32 : f32 to vector<32x1xf32>
    %68 = arith.divf %66, %67 : vector<32x1xf32>
    %69 = vector.broadcast %61 : vector<32x1xf32> to vector<32x32xf32>
    %70 = arith.subf %57, %69 : vector<32x32xf32>
    %cst_33 = arith.constant 9.99999974E-6 : f32
    %71 = vector.broadcast %cst_33 : f32 to vector<32x1xf32>
    %72 = arith.addf %68, %71 : vector<32x1xf32>
    %73 = math.rsqrt %72 : vector<32x1xf32>
    %74 = vector.broadcast %73 : vector<32x1xf32> to vector<32x32xf32>
    %75 = arith.mulf %70, %74 : vector<32x32xf32>
    %76 = vector.shape_cast %75 : vector<32x32xf32> to vector<2x16x32xf32>
    %c0_34 = arith.constant 0 : index
    %c0_35 = arith.constant 0 : index
    %c0_36 = arith.constant 0 : index
    %77 = vector.load %arg2[%c0_34, %c0_35, %c0_36] : memref<2x8x16xf32, #tpu.memory_space<vmem>>, vector<2x8x16xf32>
    %cst_37 = arith.constant dense<0.000000e+00> : vector<2x8xf32>
    %78 = vector.multi_reduction <add>, %77, %cst_37 [2] : vector<2x8x16xf32> to vector<2x8xf32>
    %79 = vector.shape_cast %78 : vector<2x8xf32> to vector<2x8x1xf32>
    %cst_38 = arith.constant 1.000000e+00 : f32
    %80 = vector.broadcast %cst_38 : f32 to vector<2x8x1xf32>
    %81 = arith.maximumf %79, %80 : vector<2x8x1xf32>
    "tpu.trace_start"() <{level = 10 : i32, message = "bwl,bld->bwd"}> : () -> ()
    %cst_39 = arith.constant dense<0.000000e+00> : vector<2x8x32xf32>
    %82 = tpu.matmul %77, %76, %cst_39 {dimension_numbers = #tpu.dot_dimension_numbers<[2], [1], [1], [2], [0, 0, 0, 1, 1, 2], [0], [0]>} : vector<2x8x16xf32>, vector<2x16x32xf32>, vector<2x8x32xf32> -> vector<2x8x32xf32>
    "tpu.trace_stop"() : () -> ()
    %83 = tpu.reciprocal %81 {approx = true} : vector<2x8x1xf32> -> vector<2x8x1xf32>
    %84 = vector.broadcast %83 : vector<2x8x1xf32> to vector<2x8x32xf32>
    %85 = arith.mulf %82, %84 : vector<2x8x32xf32>
    %c0_40 = arith.constant 0 : index
    %c0_41 = arith.constant 0 : index
    %c0_42 = arith.constant 0 : index
    %86 = vector.load %arg3[%c0_40, %c0_41, %c0_42] : memref<2x32x8xf32, #tpu.memory_space<vmem>>, vector<2x32x8xf32>
    "tpu.trace_start"() <{level = 10 : i32, message = "bsw,bwd->bsd"}> : () -> ()
    %cst_43 = arith.constant dense<0.000000e+00> : vector<2x32x32xf32>
    %87 = tpu.matmul %86, %85, %cst_43 {dimension_numbers = #tpu.dot_dimension_numbers<[2], [1], [1], [2], [0, 0, 0, 1, 1, 2], [0], [0]>} : vector<2x32x8xf32>, vector<2x8x32xf32>, vector<2x32x32xf32> -> vector<2x32x32xf32>
    "tpu.trace_stop"() : () -> ()
    %88 = vector.shape_cast %87 : vector<2x32x32xf32> to vector<64x32xf32>
    %c0_44 = arith.constant 0 : index
    %c0_45 = arith.constant 0 : index
    %c0_46 = arith.constant 0 : index
    %89 = vector.load %arg4[%c0_44, %c0_45, %c0_46] : memref<2x32x8xf32, #tpu.memory_space<vmem>>, vector<2x32x8xf32>
    "tpu.trace_start"() <{level = 10 : i32, message = "bsw,bwd->bsd"}> : () -> ()
    %cst_47 = arith.constant dense<0.000000e+00> : vector<2x32x32xf32>
    %90 = tpu.matmul %89, %85, %cst_47 {dimension_numbers = #tpu.dot_dimension_numbers<[2], [1], [1], [2], [0, 0, 0, 1, 1, 2], [0], [0]>} : vector<2x32x8xf32>, vector<2x8x32xf32>, vector<2x32x32xf32> -> vector<2x32x32xf32>
    "tpu.trace_stop"() : () -> ()
    %91 = vector.shape_cast %90 : vector<2x32x32xf32> to vector<64x32xf32>
    %c0_48 = arith.constant 0 : index
    %c0_49 = arith.constant 0 : index
    %92 = vector.load %arg9[%c0_48, %c0_49] : memref<32x32xf32, #tpu.memory_space<vmem>>, vector<32x32xf32>
    %cst_50 = arith.constant dense<0.000000e+00> : vector<64x32xf32>
    %93 = tpu.matmul %88, %92, %cst_50 {dimension_numbers = #tpu.dot_dimension_numbers<[1], [0], [0], [1], [0, 0, 1, 1], [], []>} : vector<64x32xf32>, vector<32x32xf32>, vector<64x32xf32> -> vector<64x32xf32>
    %c0_51 = arith.constant 0 : index
    %c0_52 = arith.constant 0 : index
    %94 = vector.load %arg10[%c0_51, %c0_52] : memref<32x32xf32, #tpu.memory_space<vmem>>, vector<32x32xf32>
    %cst_53 = arith.constant dense<0.000000e+00> : vector<64x32xf32>
    %95 = tpu.matmul %91, %94, %cst_53 {dimension_numbers = #tpu.dot_dimension_numbers<[1], [0], [0], [1], [0, 0, 1, 1], [], []>} : vector<64x32xf32>, vector<32x32xf32>, vector<64x32xf32> -> vector<64x32xf32>
    %96 = arith.addf %93, %95 : vector<64x32xf32>
    %c0_54 = arith.constant 0 : index
    %c0_55 = arith.constant 0 : index
    %97 = vector.load %arg11[%c0_54, %c0_55] : memref<1x32xf32, #tpu.memory_space<vmem>>, vector<1x32xf32>
    %98 = vector.broadcast %97 : vector<1x32xf32> to vector<64x32xf32>
    %99 = arith.addf %96, %98 : vector<64x32xf32>
    %cst_56 = arith.constant 0.000000e+00 : f32
    %100 = vector.broadcast %cst_56 : f32 to vector<64x32xf32>
    %101 = arith.maximumf %99, %100 : vector<64x32xf32>
    %c0_57 = arith.constant 0 : index
    %c0_58 = arith.constant 0 : index
    %102 = vector.load %arg12[%c0_57, %c0_58] : memref<32x128xf32, #tpu.memory_space<vmem>>, vector<32x128xf32>
    %cst_59 = arith.constant dense<0.000000e+00> : vector<64x128xf32>
    %103 = tpu.matmul %101, %102, %cst_59 {dimension_numbers = #tpu.dot_dimension_numbers<[1], [0], [0], [1], [0, 0, 1, 1], [], []>} : vector<64x32xf32>, vector<32x128xf32>, vector<64x128xf32> -> vector<64x128xf32>
    %c0_60 = arith.constant 0 : index
    %c0_61 = arith.constant 0 : index
    %104 = vector.load %arg13[%c0_60, %c0_61] : memref<64x128xf32, #tpu.memory_space<vmem>>, vector<64x128xf32>
    tpu.vector_store %arg13[%c0_60, %c0_61], %103 {strides = array<i32>} : memref<64x128xf32, #tpu.memory_space<vmem>>, vector<64x128xf32>,
    return
  }
}

</mosaic_0001>

<bundles_post_ra>
// kernel: gliner_forward.1
= control target key start
LH: loop header
LB: loop body
LE: loop exit
PB: predicated region body
PF: predicated region fallthrough
CT: control target
= control target key end

     0   :  { %v2633_v3 = vmov 0.0   ;;  %vm60_vm0 = vcmask 261120   ;;  %v407_v39 = vlaneseq  ;;  %v2634_v44 = vmov 0   ;;  %s3086_s5 = inlined_call_operand.vmem [shape: f32[32,384], index: 5, kind: input, shape index: {}]   ;;  %s3087_s0 = inlined_call_operand.vmem [shape: f32[2,16,32], index: 0, kind: input, shape index: {}]   ;;  %s3088_s1 = inlined_call_operand.vmem [shape: f32[2,1,16], index: 1, kind: input, shape index: {}]   ;;  %s3089_s6 = inlined_call_operand.vmem [shape: f32[128,32], index: 6, kind: input, shape index: {}]   ;;  %s3090_s7 = inlined_call_operand.vmem [shape: f32[32,64], index: 7, kind: input, shape index: {}]   ;;  %s3091_s8 = inlined_call_operand.vmem [shape: f32[64,32], index: 8, kind: input, shape index: {}]   ;;  %s3092_s2 = inlined_call_operand.vmem [shape: f32[2,8,16], index: 2, kind: input, shape index: {}]   ;;  %s3093_s3 = inlined_call_operand.vmem [shape: f32[2,32,8], index: 3, kind: input, shape index: {}]   ;;  %s3094_s10 = inlined_call_operand.vmem [shape: f32[32,32], index: 10, kind: input, shape index: {}]   ;;  %s3095_s4 = inlined_call_operand.vmem [shape: f32[2,32,8], index: 4, kind: input, shape index: {}]   ;;  %s3096_s9 = inlined_call_operand.vmem [shape: f32[32,32], index: 9, kind: input, shape index: {}]   ;;  %s3097_s12 = inlined_call_operand.vmem [shape: f32[32,128], index: 12, kind: input, shape index: {}]   ;;  %s3098_s11 = inlined_call_operand.vmem [shape: f32[1,32], index: 11, kind: input, shape index: {}]   ;;  %s3099_s13 = inlined_call_operand.vmem [shape: f32[64,128], index: 13, kind: output, shape index: {}]  }
   0x1   :  { %v49_v0 = vld [vmem:[%s3086_s5 + $0x8] sm:$0xff]  ;;  %v52_v1 = vld [vmem:[%s3086_s5 + $0x20] sm:$0xff]  ;;  %137 = vmatprep.mubr.f32.mxu0 %v2633_v3  ;;  %149 = vmatprep.mubr.f32.mxu1 %v2633_v3  ;;  %v51_v5 = vld [vmem:[%s3086_s5 + $0x18] sm:$0xff]  ;;  %vm421_vm4 = vcmask 130048   ;;  %vm899_vm6 = vcmask 523264   ;;  %vm2636_vm7 = vmmov 0  }
   0x2   :  { %v48_v2 = vld [vmem:[%s3086_s5] sm:$0xff]  ;;  %v2463_v4 = vpack.c.bf16 %v52_v1, %v49_v0  ;;  %v55_v6 = vld [vmem:[%s3086_s5 + $0x38] sm:$0xff]  ;;  %v58_v7 = vld [vmem:[%s3086_s5 + $0x50] sm:$0xff]  ;;  %v408_v41 = vshrl.u32 %v407_v39, 7  ;;  %vm1221_vm8 = vcmask 64512  }
   0x3   :  { %v2465_v8 = vpack.c.bf16 %v51_v5, %v48_v2  ;;  %v2467_v9 = vpack.c.bf16 %v58_v7, %v55_v6  ;;  %v54_v10 = vld [vmem:[%s3086_s5 + $0x30] sm:$0xff]  ;;  %v57_v11 = vld [vmem:[%s3086_s5 + $0x48] sm:$0xff]  ;;  %v56_v16 = vld [vmem:[%s3086_s5 + $0x40] sm:$0xff] }
   0x4   :  { %2464 = vmatprep.subr.bf16.mxu0 %v2463_v4  ;;  %2581 = vmatprep.subr.bf16.mxu1 %v2463_v4  ;;  %v2469_v12 = vpack.c.bf16 %v57_v11, %v54_v10  ;;  %v50_v13 = vld [vmem:[%s3086_s5 + $0x10] sm:$0xff]  ;;  %v53_v14 = vld [vmem:[%s3086_s5 + $0x28] sm:$0xff]  ;;  %v59_v17 = vld [vmem:[%s3086_s5 + $0x58] sm:$0xff]  ;;  %v409_v43 = vsub.s32 0, %v408_v41 }
   0x5   :  { %2466 = vmatpush1.bf16.msra.mxu0 %v2465_v8  ;;  %2583 = vmatpush1.bf16.msra.mxu1 %v2465_v8  ;;  %v2471_v15 = vpack.c.bf16 %v53_v14, %v50_v13  ;;  %v2748_v18 = vld [vmem:[%s3087_s0] sm:$0xff]  ;;  %v2753_v19 = vld [vmem:[%s3087_s0 + $0x10] sm:$0xff]  ;;  %v2475_v20 = vpack.c.bf16 %v59_v17, %v56_v16  ;;  %v2764_v21 = vld [vmem:[%s3087_s0 + $0x8] sm:$0xff] }
   0x6   :  { %2468 = vmatprep.subr.bf16.mxu0 %v2467_v9  ;;  %2582 = vmatprep.subr.bf16.mxu1 %v2467_v9  ;;  %v2769_v22 = vld [vmem:[%s3087_s0 + $0x18] sm:$0xff]  ;;  %v402_v40 = vld [vmem:[%s3088_s1 + $0x1] sm:$0x1]  ;;  %v401_v42 = vld [vmem:[%s3088_s1] sm:$0x1] }
   0x7   :  { %vm404_vm1 = vcmp.gt.f32.partialorder %v402_v40, 0.0  ;;  %vm403_vm2 = vcmp.gt.f32.partialorder %v401_v42, 0.0  ;;  %v636_v39 = vld [vmem:[%s3089_s6 + $0x40] sm:$0xff]  ;;  %v637_v40 = vld [vmem:[%s3089_s6 + $0x48] sm:$0xff]  ;;  %v638_v42 = vld [vmem:[%s3089_s6 + $0x50] sm:$0xff] }
   0x8   :  { %v406_v45 = vsel %vm404_vm1, 1, %v2634_v44  ;;  %v405_v46 = vsel %vm403_vm2, 1, %v2634_v44  ;;  %v2511_v41 = vpack.c.bf16 %v637_v40, %v636_v39  ;;  %v789_v40 = vld [vmem:[%s3090_s7 + $0x18] sm:$0xff] }
   0x9   :  { %2470 = vmatpush1.bf16.msra.mxu0 %v2469_v12  ;;  %2584 = vmatpush1.bf16.msra.mxu1 %v2469_v12  ;;  %v414_v47 = vrot.slane %v406_v45, %v409_v43  ;;  %v410_v48 = vrot.slane %v405_v46, %v409_v43  ;;  %v639_v43 = vld [vmem:[%s3089_s6 + $0x58] sm:$0xff]  ;;  %v640_v45 = vld [vmem:[%s3089_s6 + $0x60] sm:$0xff]  ;;  %v641_v46 = vld [vmem:[%s3089_s6 + $0x68] sm:$0xff] }
   0xa   :  { %2472 = vmatprep.subr.bf16.mxu1 %v2471_v15  ;;  %v2515_v44 = vpack.c.bf16 %v639_v43, %v638_v42  ;;  %v891_v42 = vld [vmem:[%s3091_s8] sm:$0xff]  ;;  %v892_v43 = vld [vmem:[%s3091_s8 + $0x8] sm:$0xff] }
   0xb   :  { %vm416_vm3 = vcmp.eq.s32.totalorder %v414_v47, 1  ;;  %vm415_vm5 = vcmp.eq.s32.totalorder %v410_v48, 1  ;;  %v2519_v47 = vpack.c.bf16 %v641_v46, %v640_v45  ;;  %v642_v48 = vld [vmem:[%s3089_s6 + $0x70] sm:$0xff] }
   0xc   :  { %2052 = vmatmul.mubr.msk.f32.vlgmr.msra.gmra.mrb[0].mxu0 %vm60_vm0, %v2748_v18  ;;  %2054 = vmatmul.mubr.msk.f32.vlgmr.msra.gmra.mrb[0].mxu1 %vm60_vm0, %v2753_v19 }
   0xd   :  { %143 = vmatprep.mubr.f32.mxu0 %v2633_v3  ;;  %155 = vmatprep.mubr.f32.mxu1 %v2633_v3 }
   0xe   :  { %2474 = vmatpush3.bf16.msra.mxu1 %v2471_v15 }
   0xf   :  { %2476 = vmatprep.subr.bf16.mxu1 %v2475_v20 }
  0x10   :  { %2053 = vmatmul.mubr.msk.f32.gmra.mrb[2].mxu0 %vm60_vm0, %v2764_v21  ;;  %2055 = vmatmul.mubr.msk.f32.gmra.mrb[2].mxu1 %vm60_vm0, %v2769_v22 }
  0x11   :  { %2249 = vmatprep.mubr.msk.f32.mxu1 %vm60_vm0, %v2748_v18 }
  0x12   :  { %2478 = vmatpush3.bf16.msra.mxu1 %v2475_v20 }
  0x15   :  { %2250 = vmatmul.mubr.msk.f32.vlgmr.msra.gmra.mrb[4].mxu1 %vm60_vm0, %v2764_v21 }
  0x16   :  { %2252 = vmatprep.mubr.msk.f32.mxu1 %vm60_vm0, %v2753_v19 }
  0x19   :  { %2253 = vmatmul.mubr.msk.f32.gmra.mrb[6].mxu1 %vm60_vm0, %v2769_v22 }
  0xdf   :  { %v139_v23 = vpop.f32.mrb[0].mxu0  ;;  %v151_v24 = vpop.f32.mrb[0].mxu1 }
  0xe0   :  { %v141_v25 = vpop.f32.mrb[1].mxu0  ;;  %2259 = vmatprep.mubr.f32.mxu1 %v139_v23  ;;  %v153_v26 = vpop.f32.mrb[1].mxu1  ;;  %2266 = vmatprep.mubr.f32.mxu0 %v151_v24 }
  0xe3   :  { %v145_v27 = vpop.f32.mrb[2].mxu0  ;;  %v157_v28 = vpop.f32.mrb[2].mxu1 }
  0xe4   :  { %v147_v29 = vpop.f32.mrb[3].mxu0  ;;  %v159_v30 = vpop.f32.mrb[3].mxu1 }
  0xe5   :  { %v2479_v31 = vpack.c.bf16 %v147_v29, %v141_v25  ;;  %v2483_v32 = vpack.c.bf16 %v159_v30, %v153_v26  ;;  %v628_v26 = vld [vmem:[%s3089_s6] sm:$0xff]  ;;  %v631_v30 = vld [vmem:[%s3089_s6 + $0x18] sm:$0xff] }
  0xe7   :  { %2480 = vmatprep.subr.bf16.mxu1 %v2479_v31  ;;  %2484 = vmatprep.subr.bf16.mxu0 %v2483_v32 }
  0xe8   :  { %2482 = vmatpush3.bf16.xpose.msra.mxu1 %v2479_v31  ;;  %2486 = vmatpush3.bf16.xpose.msra.mxu0 %v2483_v32  ;;  %v2251_v33 = vpop.f32.mrb[4].mxu1  ;;  %v632_v32 = vld [vmem:[%s3089_s6 + $0x20] sm:$0xff] }
  0xe9   :  { %v228_v34 = vpop.f32.mrb[5].mxu1 }
  0xea   :  { %v2487_v35 = vpack.c.bf16 %v2251_v33, %v228_v34  ;;  %v633_v33 = vld [vmem:[%s3089_s6 + $0x28] sm:$0xff] }
  0xeb   :  { %v2503_v34 = vpack.c.bf16 %v633_v33, %v632_v32 }
  0xec   :  { %2488 = vmatprep.subr.bf16.mxu1 %v2487_v35  ;;  %v2254_v36 = vpop.f32.mrb[6].mxu1 }
  0xed   :  { %v238_v37 = vpop.f32.mrb[7].mxu1 }
  0xee   :  { %v2783_v38 = vpack.c.bf16 %v2254_v36, %v238_v37  ;;  %v635_v36 = vld [vmem:[%s3089_s6 + $0x38] sm:$0xff] }
  0xef   :  { %2260 = vmatmul.mubr.f32.vlgmr.msra.gmra.mrb[8].mxu1 %v145_v27  ;;  %2267 = vmatmul.mubr.f32.vlgmr.msra.gmra.mrb[4].mxu0 %v157_v28  ;;  %v629_v27 = vld [vmem:[%s3089_s6 + $0x8] sm:$0xff]  ;;  %v630_v28 = vld [vmem:[%s3089_s6 + $0x10] sm:$0xff] }
  0xf0   :  { %2490 = vmatpush3.bf16.msra.mxu1 %v2487_v35  ;;  %v2495_v29 = vpack.c.bf16 %v629_v27, %v628_v26  ;;  %v2499_v31 = vpack.c.bf16 %v631_v30, %v630_v28  ;;  %v634_v35 = vld [vmem:[%s3089_s6 + $0x30] sm:$0xff] }
  0xf1   :  { %2492 = vmatprep.subr.bf16.mxu1 %v2783_v38  ;;  %v2507_v37 = vpack.c.bf16 %v635_v36, %v634_v35  ;;  %v786_v35 = vld [vmem:[%s3090_s7] sm:$0xff]  ;;  %v787_v36 = vld [vmem:[%s3090_s7 + $0x8] sm:$0xff] }
  0xf2   :  { %2496 = vmatprep.subr.bf16.mxu0 %v2495_v29  ;;  %v2527_v39 = vpack.c.bf16 %v787_v36, %v786_v35 }
  0xf3   :  { %2498 = vmatpush3.bf16.msra.mxu0 %v2495_v29 }
  0xf4   :  { %2500 = vmatprep.subr.bf16.mxu0 %v2499_v31 }
  0xf7   :  { %2502 = vmatpush3.bf16.msra.mxu0 %v2499_v31 }
  0xf8   :  { %2504 = vmatprep.subr.bf16.mxu0 %v2503_v34 }
  0xfb   :  { %2506 = vmatpush3.bf16.msra.mxu0 %v2503_v34 }
  0xfc   :  { %2508 = vmatprep.subr.bf16.mxu0 %v2507_v37 }
  0xff   :  { %2510 = vmatpush3.bf16.msra.mxu0 %v2507_v37  ;;  %v788_v37 = vld [vmem:[%s3090_s7 + $0x10] sm:$0xff] }
 0x100   :  { %2512 = vmatprep.subr.bf16.mxu0 %v2511_v41 }
 0x103   :  { %2514 = vmatpush3.bf16.msra.mxu0 %v2511_v41  ;;  %v2531_v41 = vpack.c.bf16 %v789_v40, %v788_v37 }
 0x104   :  { %2516 = vmatprep.subr.bf16.mxu0 %v2515_v44 }
 0x107   :  { %2518 = vmatpush3.bf16.msra.mxu0 %v2515_v44  ;;  %v2535_v44 = vpack.c.bf16 %v892_v43, %v891_v42 }
 0x108   :  { %2520 = vmatprep.subr.bf16.mxu0 %v2519_v47 }
 0x10b   :  { %2522 = vmatpush3.bf16.msra.mxu0 %v2519_v47 }
 0x1c2   :  { %v2261_v49 = vpop.f32.mrb[8].mxu1  ;;  %v2268_v50 = vpop.f32.mrb[4].mxu0 }
 0x1c3   :  { %v398_v51 = vmul.f32 0.17677669, %v2261_v49  ;;  %v313_v52 = vpop.f32.mrb[9].mxu1  ;;  %v388_v53 = vpop.f32.mrb[5].mxu0  ;;  %v400_v54 = vmul.f32 0.17677669, %v2268_v50 }
 0x1c4   :  { %v397_v55 = vmul.f32 0.17677669, %v313_v52  ;;  %v399_v56 = vmul.f32 0.17677669, %v388_v53  ;;  %v643_v49 = vld [vmem:[%s3089_s6 + $0x78] sm:$0xff] }
 0x1c5   :  { %v420_v61 = vsel %vm416_vm3, %v400_v54, -1e+09  ;;  %v418_v62 = vsel %vm415_vm5, %v398_v51, -1e+09  ;;  %v2523_v50 = vpack.c.bf16 %v643_v49, %v642_v48 }
 0x1c6   :  { %v419_v57 = vsel %vm416_vm3, %v399_v56, -1e+09  ;;  %v417_v58 = vsel %vm415_vm5, %v397_v55, -1e+09  ;;  %v431_v63 = vsel %vm421_vm4, %v420_v61, -inf  ;;  %v425_v0 = vsel %vm421_vm4, %v418_v62, -inf }
 0x1c7   :  { %v428_v59 = vsel %vm421_vm4, %v419_v57, -inf  ;;  %v422_v60 = vsel %vm421_vm4, %v417_v58, -inf  ;;  %2524 = vmatprep.subr.bf16.mxu0 %v2523_v50 }
 0x1c8   :  { %429 = vmax.xlane.f32.xlu1 %v428_v59  ;;  %423 = vmax.xlane.f32.xlu0 %v422_v60 }
 0x1c9   :  { %2526 = vmatpush3.bf16.msra.mxu0 %v2523_v50 }
 0x1cc   :  { %432 = vmax.xlane.f32.xlu1 %v431_v63  ;;  %426 = vmax.xlane.f32.xlu0 %v425_v0 }
 0x255   :  { %v430_v1 = vpop.xlane.xlu1 %429  ;;  %v424_v2 = vpop.xlane.xlu0 %423 }
 0x256   :  { %v436_v4 = vsub.f32 %v419_v57, %v430_v1  ;;  %v434_v5 = vsub.f32 %v417_v58, %v424_v2 }
 0x258   :  { %v438_v6 = vmul.f32 1.442695, %v434_v5  ;;  %v442_v7 = vmul.f32 1.442695, %v436_v4 }
 0x259   :  { %v433_v8 = vpop.xlane.xlu1 %432  ;;  %v427_v9 = vpop.xlane.xlu0 %426 }
 0x25a   :  { %v437_v10 = vsub.f32 %v420_v61, %v433_v8  ;;  %v435_v11 = vsub.f32 %v418_v62, %v427_v9  ;;  %2597 = vpow2.f32 %v438_v6 }
 0x25b   :  { %2599 = vpow2.f32 %v442_v7 }
 0x25c   :  { %v440_v12 = vmul.f32 1.442695, %v435_v11  ;;  %v444_v13 = vmul.f32 1.442695, %v437_v10 }
 0x25e   :  { %2601 = vpow2.f32 %v440_v12 }
 0x25f   :  { %2603 = vpow2.f32 %v444_v13 }
 0x264   :  { %v2598_v14 = vpop.eup %2597 }
 0x265   :  { %v446_v15 = vsel %vm421_vm4, %v2598_v14, 0.0  ;;  %v2797_v16 = vpop.eup %2599 }
 0x266   :  { %447 = vadd.xlane.f32.xlu0 %v446_v15  ;;  %v452_v20 = vsel %vm421_vm4, %v2797_v16, 0.0 }
 0x268   :  { %v2602_v17 = vpop.eup %2601 }
 0x269   :  { %v449_v23 = vsel %vm421_vm4, %v2602_v17, 0.0  ;;  %v2802_v24 = vpop.eup %2603 }
 0x26a   :  { %453 = vadd.xlane.f32.xlu0 %v452_v20  ;;  %450 = vadd.xlane.f32.xlu1 %v449_v23  ;;  %v455_v25 = vsel %vm421_vm4, %v2802_v24, 0.0 }
 0x26e   :  { %456 = vadd.xlane.f32.xlu1 %v455_v25 }
 0x2f3   :  { %v448_v51 = vpop.xlane.xlu0 %447 }
 0x2f4   :  { %2605 = vrcp.f32 %v448_v51 }
 0x2f7   :  { %v451_v52 = vpop.xlane.xlu1 %450  ;;  %v454_v53 = vpop.xlane.xlu0 %453 }
 0x2f8   :  { %2607 = vrcp.f32 %v451_v52 }
 0x2f9   :  { %2609 = vrcp.f32 %v454_v53 }
 0x2fb   :  { %v457_v54 = vpop.xlane.xlu1 %456 }
 0x2fc   :  { %2611 = vrcp.f32 %v457_v54 }
 0x2fe   :  { %v2606_v55 = vpop.eup %2605 }
 0x2ff   :  { %v462_v56 = vmul.f32 %v2606_v55, %v2598_v14 }
 0x301   :  { %2273 = vmatprep.mubr.msk.f32.mxu1 %vm421_vm4, %v462_v56 }
 0x302   :  { %v2608_v57 = vpop.eup %2607 }
 0x303   :  { %v2610_v58 = vpop.eup %2609  ;;  %v463_v59 = vmul.f32 %v2608_v57, %v2602_v17 }
 0x304   :  { %v464_v60 = vmul.f32 %v2610_v58, %v2797_v16  ;;  %v893_v58 = vld [vmem:[%s3091_s8 + $0x10] sm:$0xff] }
 0x305   :  { %2274 = vmatmul.mubr.msk.f32.vlgmr.msra.gmra.mrb[10].mxu1 %vm421_vm4, %v463_v59  ;;  %v894_v59 = vld [vmem:[%s3091_s8 + $0x18] sm:$0xff] }
 0x306   :  { %v2612_v61 = vpop.eup %2611  ;;  %2494 = vmatpush3.bf16.msra.mxu1 %v2783_v38  ;;  %2280 = vmatprep.mubr.msk.f32.mxu1 %vm421_vm4, %v464_v60 }
 0x307   :  { %v465_v62 = vmul.f32 %v2612_v61, %v2802_v24  ;;  %2528 = vmatprep.subr.bf16.mxu1 %v2527_v39 }
 0x309   :  { %2281 = vmatmul.mubr.msk.f32.vlgmr.msra.gmra.mrb[12].mxu1 %vm421_vm4, %v465_v62 }
 0x30a   :  { %2530 = vmatpush3.bf16.msra.mxu1 %v2527_v39 }
 0x30b   :  { %2532 = vmatprep.subr.bf16.mxu1 %v2531_v41 }
 0x30e   :  { %2534 = vmatpush3.bf16.msra.mxu1 %v2531_v41 }
 0x30f   :  { %2536 = vmatprep.subr.bf16.mxu1 %v2535_v44 }
 0x3d8   :  { %v2275_v63 = vpop.f32.mrb[10].mxu1 }
 0x3d9   :  { %v538_v0 = vpop.f32.mrb[11].mxu1 }
 0x3da   :  { %2315 = vmatprep.mubr.f32.mxu0 %v538_v0 }
 0x3db   :  { %2316 = vmatmul.mubr.f32.vlgmr.msra.gmra.mrb[6].mxu0 %v2275_v63  ;;  %v2539_v63 = vpack.c.bf16 %v894_v59, %v893_v58 }
 0x3dc   :  { %v2282_v1 = vpop.f32.mrb[12].mxu1 }
 0x3dd   :  { %v619_v2 = vpop.f32.mrb[13].mxu1 }
 0x3de   :  { %2318 = vmatprep.mubr.f32.mxu0 %v619_v2  ;;  %v896_v2 = vld [vmem:[%s3091_s8 + $0x28] sm:$0xff] }
 0x3df   :  { %2319 = vmatmul.mubr.f32.gmra.mrb[8].mxu0 %v2282_v1  ;;  %v895_v1 = vld [vmem:[%s3091_s8 + $0x20] sm:$0xff] }
 0x4ae   :  { %v2317_v4 = vpop.f32.mrb[6].mxu0 }
 0x4af   :  { %v730_v5 = vadd.f32 %v2317_v4, %v2764_v21  ;;  %v710_v6 = vpop.f32.mrb[7].mxu0 }
 0x4b0   :  { %v729_v38 = vadd.f32 %v710_v6, %v2748_v18 }
 0x4b1   :  { %v736_v7 = vsel %vm60_vm0, %v730_v5, 0.0 }
 0x4b2   :  { %737 = vadd.xlane.f32.xlu1 %v736_v7  ;;  %v2320_v8 = vpop.f32.mrb[8].mxu0  ;;  %v733_v9 = vsel %vm60_vm0, %v729_v38, 0.0  ;;  %v897_v7 = vld [vmem:[%s3091_s8 + $0x30] sm:$0xff] }
 0x4b3   :  { %v732_v10 = vadd.f32 %v2320_v8, %v2769_v22  ;;  %734 = vadd.xlane.f32.xlu0 %v733_v9  ;;  %v720_v11 = vpop.f32.mrb[9].mxu0  ;;  %v898_v8 = vld [vmem:[%s3091_s8 + $0x38] sm:$0xff] }
 0x4b4   :  { %v731_v12 = vadd.f32 %v720_v11, %v2753_v19  ;;  %v2547_v9 = vpack.c.bf16 %v898_v8, %v897_v7 }
 0x4b5   :  { %v742_v13 = vsel %vm60_vm0, %v732_v10, 0.0 }
 0x4b6   :  { %743 = vadd.xlane.f32.xlu1 %v742_v13  ;;  %v739_v21 = vsel %vm60_vm0, %v731_v12, 0.0 }
 0x4b7   :  { %740 = vadd.xlane.f32.xlu0 %v739_v21 }
 0x53f   :  { %v738_v14 = vpop.xlane.xlu1 %737 }
 0x540   :  { %v747_v18 = vmul.f32 0.03125, %v738_v14  ;;  %v735_v15 = vpop.xlane.xlu0 %734 }
 0x541   :  { %v746_v16 = vmul.f32 0.03125, %v735_v15 }
 0x542   :  { %v751_v17 = vsub.f32 %v730_v5, %v747_v18 }
 0x543   :  { %v750_v20 = vsub.f32 %v729_v38, %v746_v16  ;;  %v744_v23 = vpop.xlane.xlu1 %743  ;;  %v2543_v38 = vpack.c.bf16 %v896_v2, %v895_v1 }
 0x544   :  { %v749_v24 = vmul.f32 0.03125, %v744_v23  ;;  %v741_v25 = vpop.xlane.xlu0 %740  ;;  %v755_v22 = vmul.f32 %v751_v17, %v751_v17 }
 0x545   :  { %v748_v26 = vmul.f32 0.03125, %v741_v25  ;;  %v754_v27 = vmul.f32 %v750_v20, %v750_v20 }
 0x546   :  { %v753_v28 = vsub.f32 %v732_v10, %v749_v24  ;;  %v761_v19 = vsel %vm60_vm0, %v755_v22, 0.0 }
 0x547   :  { %v752_v29 = vsub.f32 %v731_v12, %v748_v26  ;;  %762 = vadd.xlane.f32.xlu1 %v761_v19  ;;  %v758_v30 = vsel %vm60_vm0, %v754_v27, 0.0 }
 0x548   :  { %759 = vadd.xlane.f32.xlu0 %v758_v30  ;;  %v757_v31 = vmul.f32 %v753_v28, %v753_v28 }
 0x549   :  { %v756_v32 = vmul.f32 %v752_v29, %v752_v29 }
 0x54a   :  { %v767_v33 = vsel %vm60_vm0, %v757_v31, 0.0 }
 0x54b   :  { %768 = vadd.xlane.f32.xlu1 %v767_v33  ;;  %v764_v34 = vsel %vm60_vm0, %v756_v32, 0.0 }
 0x54c   :  { %765 = vadd.xlane.f32.xlu0 %v764_v34 }
 0x5d4   :  { %v763_v45 = vpop.xlane.xlu1 %762 }
 0x5d5   :  { %v771_v46 = vmul.f32 0.03125, %v763_v45  ;;  %v760_v47 = vpop.xlane.xlu0 %759 }
 0x5d6   :  { %v770_v48 = vmul.f32 0.03125, %v760_v47 }
 0x5d7   :  { %v775_v49 = vadd.f32 1e-05, %v771_v46 }
 0x5d8   :  { %v774_v50 = vadd.f32 1e-05, %v770_v48  ;;  %v769_v51 = vpop.xlane.xlu1 %768 }
 0x5d9   :  { %2613 = vrsqrt.f32 %v775_v49  ;;  %v773_v52 = vmul.f32 0.03125, %v769_v51  ;;  %v766_v53 = vpop.xlane.xlu0 %765  ;;  %v2635_v51 = vmov 0.0|0.0  }
 0x5da   :  { %2615 = vrsqrt.f32 %v774_v50  ;;  %v772_v54 = vmul.f32 0.03125, %v766_v53  ;;  %v1054_v53 = vld [vmem:[%s3092_s2 + $0x8] sm:$0xff] }
 0x5db   :  { %v777_v55 = vadd.f32 1e-05, %v773_v52  ;;  %v1053_v52 = vld [vmem:[%s3092_s2] sm:$0xff] }
 0x5dc   :  { %v776_v56 = vadd.f32 1e-05, %v772_v54  ;;  %v1055_v54 = vsel %vm421_vm4, %v1053_v52, 0.0 }
 0x5dd   :  { %2617 = vrsqrt.f32 %v777_v55  ;;  %v1058_v55 = vsel %vm421_vm4, %v1054_v53, 0.0 }
 0x5de   :  { %2619 = vrsqrt.f32 %v776_v56 }
 0x5e3   :  { %v2614_v57 = vpop.eup %2613 }
 0x5e4   :  { %v2616_v60 = vpop.eup %2615  ;;  %v783_v62 = vmul.f32 %v2614_v57, %v751_v17 }
 0x5e5   :  { %v782_v61 = vmul.f32 %v2616_v60, %v750_v20 }
 0x5e7   :  { %v2618_v0 = vpop.eup %2617  ;;  %2329 = vmatprep.mubr.msk.f32.mxu1 %vm60_vm0, %v782_v61 }
 0x5e8   :  { %v2620_v4 = vpop.eup %2619  ;;  %2330 = vmatmul.mubr.msk.f32.vlgmr.msra.gmra.mrb[14].mxu1 %vm60_vm0, %v783_v62  ;;  %v785_v6 = vmul.f32 %v2618_v0, %v753_v28 }
 0x5e9   :  { %v784_v5 = vmul.f32 %v2620_v4, %v752_v29  ;;  %2538 = vmatpush3.bf16.msra.mxu1 %v2535_v44 }
 0x5ea   :  { %2540 = vmatprep.subr.bf16.mxu1 %v2539_v63 }
 0x5eb   :  { %2332 = vmatprep.mubr.msk.f32.mxu1 %vm60_vm0, %v784_v5 }
 0x5ec   :  { %2333 = vmatmul.mubr.msk.f32.gmra.mrb[16].mxu1 %vm60_vm0, %v785_v6 }
 0x5ed   :  { %2542 = vmatpush3.bf16.msra.mxu1 %v2539_v63 }
 0x5ee   :  { %2544 = vmatprep.subr.bf16.mxu1 %v2543_v38 }
 0x5f1   :  { %2546 = vmatpush3.bf16.msra.mxu1 %v2543_v38 }
 0x5f2   :  { %2548 = vmatprep.subr.bf16.mxu1 %v2547_v9 }
 0x5f5   :  { %2550 = vmatpush3.bf16.msra.mxu1 %v2547_v9 }
 0x5f6   :  { %2551 = vmatprep.subr.bf16.mxu1 %v2635_v51 }
 0x6bb   :  { %v2331_v10 = vpop.f32.mrb[14].mxu1 }
 0x6bc   :  { %v868_v11 = vpop.f32.mrb[15].mxu1  ;;  %v888_v13 = vmax.f32 %v2331_v10, 0.0 }
 0x6bd   :  { %v887_v12 = vmax.f32 %v868_v11, 0.0 }
 0x6bf   :  { %v2334_v21 = vpop.f32.mrb[16].mxu1  ;;  %2351 = vmatprep.mubr.msk.f32.mxu1 %vm899_vm6, %v887_v12 }
 0x6c0   :  { %v878_v14 = vpop.f32.mrb[17].mxu1  ;;  %2352 = vmatmul.mubr.msk.f32.vlgmr.msra.gmra.mrb[18].mxu1 %vm899_vm6, %v888_v13  ;;  %v890_v15 = vmax.f32 %v2334_v21, 0.0  ;;  %v1213_v21 = vld [vmem:[%s3093_s3] sm:$0xff] }
 0x6c1   :  { %v889_v18 = vmax.f32 %v878_v14, 0.0  ;;  %2373 = vmatprep.mubr.msk.f32.mxu0 %vm1221_vm8, %v1213_v21  ;;  %v1217_v14 = vld [vmem:[%s3093_s3 + $0x20] sm:$0xff] }
 0x6c3   :  { %2354 = vmatprep.mubr.msk.f32.mxu1 %vm899_vm6, %v889_v18 }
 0x6c4   :  { %2355 = vmatmul.mubr.msk.f32.gmra.mrb[20].mxu1 %vm899_vm6, %v890_v15 }
 0x6c5   :  { %2361 = vmatprep.mubr.msk.f32.mxu1 %vm2636_vm7, %v2633_v3 }
 0x793   :  { %v2353_v16 = vpop.f32.mrb[18].mxu1 }
 0x794   :  { %v998_v17 = vadd.f32 %v2353_v16, %v783_v62  ;;  %v978_v20 = vpop.f32.mrb[19].mxu1 }
 0x795   :  { %v997_v23 = vadd.f32 %v978_v20, %v782_v61 }
 0x796   :  { %v1004_v24 = vsel %vm60_vm0, %v998_v17, 0.0 }
 0x797   :  { %1005 = vadd.xlane.f32.xlu1 %v1004_v24  ;;  %v2356_v25 = vpop.f32.mrb[20].mxu1  ;;  %v1001_v22 = vsel %vm60_vm0, %v997_v23, 0.0  ;;  %v1623_v24 = vld [vmem:[%s3094_s10 + $0x8] sm:$0xff] }
 0x798   :  { %v1000_v26 = vadd.f32 %v2356_v25, %v785_v6  ;;  %1002 = vadd.xlane.f32.xlu0 %v1001_v22  ;;  %v988_v27 = vpop.f32.mrb[21].mxu1 }
 0x799   :  { %v999_v28 = vadd.f32 %v988_v27, %v784_v5  ;;  %v1214_v27 = vld [vmem:[%s3093_s3 + $0x8] sm:$0xff] }
 0x79a   :  { %v1010_v19 = vsel %vm60_vm0, %v1000_v26, 0.0 }
 0x79b   :  { %1011 = vadd.xlane.f32.xlu1 %v1010_v19  ;;  %v1007_v29 = vsel %vm60_vm0, %v999_v28, 0.0 }
 0x79c   :  { %1008 = vadd.xlane.f32.xlu0 %v1007_v29 }
 0x824   :  { %v1006_v30 = vpop.xlane.xlu1 %1005 }
 0x825   :  { %v1014_v31 = vmul.f32 0.03125, %v1006_v30  ;;  %v1003_v32 = vpop.xlane.xlu0 %1002 }
 0x826   :  { %v1013_v33 = vmul.f32 0.03125, %v1003_v32  ;;  %v1216_v32 = vld [vmem:[%s3093_s3 + $0x18] sm:$0xff] }
 0x827   :  { %v1018_v34 = vsub.f32 %v998_v17, %v1014_v31 }
 0x828   :  { %v1017_v35 = vsub.f32 %v997_v23, %v1013_v33  ;;  %v1012_v36 = vpop.xlane.xlu1 %1011  ;;  %v1622_v23 = vld [vmem:[%s3094_s10] sm:$0xff]  ;;  %v1218_v33 = vld [vmem:[%s3093_s3 + $0x28] sm:$0xff] }
 0x829   :  { %v1016_v37 = vmul.f32 0.03125, %v1012_v36  ;;  %v1009_v39 = vpop.xlane.xlu0 %1008  ;;  %v1022_v40 = vmul.f32 %v1018_v34, %v1018_v34  ;;  %v2557_v19 = vpack.c.bf16 %v1623_v24, %v1622_v23  ;;  %v1417_v36 = vld [vmem:[%s3095_s4 + $0x8] sm:$0xff] }
 0x82a   :  { %v1015_v41 = vmul.f32 0.03125, %v1009_v39  ;;  %v1021_v42 = vmul.f32 %v1017_v35, %v1017_v35  ;;  %v1418_v39 = vld [vmem:[%s3095_s4 + $0x10] sm:$0xff] }
 0x82b   :  { %v1020_v43 = vsub.f32 %v1000_v26, %v1016_v37  ;;  %v1028_v44 = vsel %vm60_vm0, %v1022_v40, 0.0  ;;  %v1220_v37 = vld [vmem:[%s3093_s3 + $0x38] sm:$0xff]  ;;  %v1420_v40 = vld [vmem:[%s3095_s4 + $0x20] sm:$0xff] }
 0x82c   :  { %v1019_v45 = vsub.f32 %v999_v28, %v1015_v41  ;;  %1029 = vadd.xlane.f32.xlu1 %v1028_v44  ;;  %v1025_v46 = vsel %vm60_vm0, %v1021_v42, 0.0  ;;  %v1215_v28 = vld [vmem:[%s3093_s3 + $0x10] sm:$0xff]  ;;  %v1419_v41 = vld [vmem:[%s3095_s4 + $0x18] sm:$0xff]  ;;  %v1421_v42 = vld [vmem:[%s3095_s4 + $0x28] sm:$0xff] }
 0x82d   :  { %1026 = vadd.xlane.f32.xlu0 %v1025_v46  ;;  %v1024_v47 = vmul.f32 %v1020_v43, %v1020_v43  ;;  %v1423_v44 = vld [vmem:[%s3095_s4 + $0x38] sm:$0xff] }
 0x82e   :  { %v1023_v48 = vmul.f32 %v1019_v45, %v1019_v45  ;;  %v1625_v46 = vld [vmem:[%s3094_s10 + $0x18] sm:$0xff] }
 0x82f   :  { %v1034_v49 = vsel %vm60_vm0, %v1024_v47, 0.0 }
 0x830   :  { %1035 = vadd.xlane.f32.xlu1 %v1034_v49  ;;  %v1031_v50 = vsel %vm60_vm0, %v1023_v48, 0.0  ;;  %v1618_v48 = vld [vmem:[%s3096_s9] sm:$0xff]  ;;  %v1619_v49 = vld [vmem:[%s3096_s9 + $0x8] sm:$0xff] }
 0x831   :  { %1032 = vadd.xlane.f32.xlu0 %v1031_v50  ;;  %v2565_v50 = vpack.c.bf16 %v1619_v49, %v1618_v48 }
 0x834   :  { %1059 = vadd.xlane.f32.xlu1 %v1058_v55 }
 0x835   :  { %1056 = vadd.xlane.f32.xlu0 %v1055_v54 }
 0x8b9   :  { %v1030_v56 = vpop.xlane.xlu1 %1029 }
 0x8ba   :  { %v1038_v57 = vmul.f32 0.03125, %v1030_v56  ;;  %v1027_v58 = vpop.xlane.xlu0 %1026 }
 0x8bb   :  { %v1037_v59 = vmul.f32 0.03125, %v1027_v58 }
 0x8bc   :  { %v1042_v60 = vadd.f32 1e-05, %v1038_v57 }
 0x8bd   :  { %v1041_v61 = vadd.f32 1e-05, %v1037_v59  ;;  %v1036_v62 = vpop.xlane.xlu1 %1035 }
 0x8be   :  { %2621 = vrsqrt.f32 %v1042_v60  ;;  %v1040_v63 = vmul.f32 0.03125, %v1036_v62  ;;  %v1033_v0 = vpop.xlane.xlu0 %1032  ;;  %v1620_v60 = vld [vmem:[%s3096_s9 + $0x10] sm:$0xff] }
 0x8bf   :  { %2623 = vrsqrt.f32 %v1041_v61  ;;  %v1039_v1 = vmul.f32 0.03125, %v1033_v0  ;;  %v1621_v61 = vld [vmem:[%s3096_s9 + $0x18] sm:$0xff] }
 0x8c0   :  { %v1044_v2 = vadd.f32 1e-05, %v1040_v63 }
 0x8c1   :  { %v1043_v4 = vadd.f32 1e-05, %v1039_v1  ;;  %v1060_v16 = vpop.xlane.xlu1 %1059 }
 0x8c2   :  { %2625 = vrsqrt.f32 %v1044_v2  ;;  %v1057_v18 = vpop.xlane.xlu0 %1056  ;;  %v2569_v2 = vpack.c.bf16 %v1621_v61, %v1620_v60 }
 0x8c3   :  { %2627 = vrsqrt.f32 %v1043_v4  ;;  %v1061_v15 = vmax.f32 %v1057_v18, 1.0 }
 0x8c5   :  { %2629 = vrcp.f32 %v1061_v15 }
 0x8c8   :  { %v2622_v5 = vpop.eup %2621 }
 0x8c9   :  { %v2624_v6 = vpop.eup %2623  ;;  %v1050_v38 = vmul.f32 %v2622_v5, %v1018_v34  ;;  %v1416_v34 = vld [vmem:[%s3095_s4] sm:$0xff] }
 0x8ca   :  { %v1049_v7 = vmul.f32 %v2624_v6, %v1017_v35  ;;  %v1219_v35 = vld [vmem:[%s3093_s3 + $0x30] sm:$0xff] }
 0x8cc   :  { %v2626_v8 = vpop.eup %2625  ;;  %v2552_v9 = vpack.c.bf16 %v1050_v38, %v1049_v7 }
 0x8cd   :  { %v2628_v10 = vpop.eup %2627  ;;  %v1052_v11 = vmul.f32 %v2626_v8, %v1020_v43  ;;  %v1422_v43 = vld [vmem:[%s3095_s4 + $0x30] sm:$0xff] }
 0x8ce   :  { %2553 = vmatpush3.bf16.msra.mxu1 %v2552_v9  ;;  %v1051_v12 = vmul.f32 %v2628_v10, %v1019_v45  ;;  %v1624_v45 = vld [vmem:[%s3094_s10 + $0x10] sm:$0xff]  ;;  %v1910_v10 = vld [vmem:[%s3097_s12 + $0x18] sm:$0xff] }
 0x8cf   :  { %2554 = vmatprep.subr.bf16.mxu1 %v2635_v51  ;;  %v2630_v17 = vpop.eup %2629  ;;  %v2561_v47 = vpack.c.bf16 %v1625_v46, %v1624_v45  ;;  %v1907_v51 = vld [vmem:[%s3097_s12] sm:$0xff]  ;;  %v1909_v9 = vld [vmem:[%s3097_s12 + $0x10] sm:$0xff] }
 0x8d0   :  { %v2555_v13 = vpack.c.bf16 %v1052_v11, %v1051_v12  ;;  %v2577_v11 = vpack.c.bf16 %v1910_v10, %v1909_v9  ;;  %v2106_v12 = vld [vmem:[%s3098_s11] ss:$0 sm:$0xff] }
 0x8d1   :  { %2362 = vmatmul.mubr.msk.f32.vlgmr.msra.gmra.mrb[22].mxu1 %vm421_vm4, %v1053_v52  ;;  %v1908_v52 = vld [vmem:[%s3097_s12 + $0x8] sm:$0xff] }
 0x8d2   :  { %2556 = vmatpush3.bf16.msra.mxu1 %v2555_v13  ;;  %2368 = vmatprep.mubr.msk.f32.mxu1 %vm2636_vm7, %v2633_v3  ;;  %v1062_v3 = vmax.f32 %v1060_v16, 1.0 }
 0x8d4   :  { %2631 = vrcp.f32 %v1062_v3 }
 0x8d5   :  { %2369 = vmatmul.mubr.msk.f32.vlgmr.msra.gmra.mrb[24].mxu1 %vm421_vm4, %v1054_v53  ;;  %v2573_v53 = vpack.c.bf16 %v1908_v52, %v1907_v51 }
 0x8d6   :  { %2381 = vmatprep.mubr.msk.f32.mxu1 %vm1221_vm8, %v1217_v14 }
 0x8de   :  { %v2632_v26 = vpop.eup %2631 }
 0x9a4   :  { %v1132_v20 = vpop.f32.mrb[22].mxu1 }
 0x9a5   :  { %v1211_v25 = vmul.f32 %v2630_v17, %v1132_v20  ;;  %v2363_v22 = vpop.f32.mrb[23].mxu1 }
 0x9a7   :  { %2371 = vmatprep.subr.mxu0 %v1211_v25 }
 0x9a8   :  { %2372 = vmatpush3.msra.mxu0 %v1211_v25  ;;  %v1205_v29 = vpop.f32.mrb[24].mxu1 }
 0x9a9   :  { %2374 = vmatmul.mubr.msk.f32.vlgmr.msra.gmra.mrb[10].mxu0 %vm1221_vm8, %v1214_v27  ;;  %2387 = vmatprep.subr.mxu0 %v1211_v25  ;;  %v1212_v30 = vmul.f32 %v2632_v26, %v1205_v29  ;;  %v2370_v31 = vpop.f32.mrb[25].mxu1 }
 0x9aa   :  { %2388 = vmatpush3.msra.mxu0 %v1211_v25  ;;  %2376 = vmatprep.mubr.msk.f32.mxu0 %vm1221_vm8, %v1215_v28 }
 0x9ab   :  { %2379 = vmatprep.subr.mxu1 %v1212_v30  ;;  %2558 = vmatprep.subr.bf16.mxu0 %v2557_v19 }
 0x9ac   :  { %2380 = vmatpush3.msra.mxu1 %v1212_v30 }
 0x9ad   :  { %2377 = vmatmul.mubr.msk.f32.gmra.mrb[12].mxu0 %vm1221_vm8, %v1216_v32  ;;  %2382 = vmatmul.mubr.msk.f32.vlgmr.msra.gmra.mrb[26].mxu1 %vm1221_vm8, %v1218_v33 }
 0x9ae   :  { %2389 = vmatprep.mubr.msk.f32.mxu0 %vm1221_vm8, %v1416_v34  ;;  %2395 = vmatprep.subr.mxu1 %v1212_v30 }
 0x9af   :  { %2396 = vmatpush3.msra.mxu1 %v1212_v30  ;;  %2384 = vmatprep.mubr.msk.f32.mxu1 %vm1221_vm8, %v1219_v35 }
 0x9b0   :  { %2574 = vmatprep.subr.bf16.mxu1 %v2573_v53 }
 0x9b1   :  { %2390 = vmatmul.mubr.msk.f32.vlgmr.msra.gmra.mrb[14].mxu0 %vm1221_vm8, %v1417_v36  ;;  %2385 = vmatmul.mubr.msk.f32.gmra.mrb[28].mxu1 %vm1221_vm8, %v1220_v37 }
 0x9b2   :  { %2392 = vmatprep.mubr.msk.f32.mxu0 %vm1221_vm8, %v1418_v39  ;;  %2397 = vmatprep.mubr.msk.f32.mxu1 %vm1221_vm8, %v1420_v40 }
 0x9b3   :  { %2560 = vmatpush3.bf16.msra.mxu0 %v2557_v19 }
 0x9b4   :  { %2562 = vmatprep.subr.bf16.mxu0 %v2561_v47 }
 0x9b5   :  { %2393 = vmatmul.mubr.msk.f32.gmra.mrb[16].mxu0 %vm1221_vm8, %v1419_v41  ;;  %2398 = vmatmul.mubr.msk.f32.vlgmr.msra.gmra.mrb[30].mxu1 %vm1221_vm8, %v1421_v42 }
 0x9b6   :  { %2400 = vmatprep.mubr.msk.f32.mxu1 %vm1221_vm8, %v1422_v43  ;;  %2576 = vmatpush3.bf16.msra.mxu1 %v2573_v53 }
 0x9b7   :  { %2564 = vmatpush3.bf16.msra.mxu0 %v2561_v47  ;;  %2578 = vmatprep.subr.bf16.mxu1 %v2577_v11 }
 0x9b8   :  { %2566 = vmatprep.subr.bf16.mxu0 %v2565_v50 }
 0x9b9   :  { %2401 = vmatmul.mubr.msk.f32.gmra.mrb[32].mxu1 %vm1221_vm8, %v1423_v44 }
 0x9ba   :  { %2580 = vmatpush3.bf16.msra.mxu1 %v2577_v11 }
 0xa7c   :  { %v2375_v54 = vpop.f32.mrb[10].mxu0 }
 0xa7d   :  { %v1300_v55 = vpop.f32.mrb[11].mxu0 }
 0xa80   :  { %v2378_v56 = vpop.f32.mrb[12].mxu0  ;;  %v2383_v57 = vpop.f32.mrb[26].mxu1 }
 0xa81   :  { %v1310_v58 = vpop.f32.mrb[13].mxu0  ;;  %v1397_v59 = vpop.f32.mrb[27].mxu1 }
 0xa84   :  { %v2391_v62 = vpop.f32.mrb[14].mxu0  ;;  %v2386_v63 = vpop.f32.mrb[28].mxu1 }
 0xa85   :  { %v1502_v0 = vpop.f32.mrb[15].mxu0  ;;  %v1407_v1 = vpop.f32.mrb[29].mxu1 }
 0xa86   :  { %2411 = vmatprep.mubr.msk.f32.mxu0 %vm60_vm0, %v1502_v0 }
 0xa87   :  { %2412 = vmatmul.mubr.msk.f32.vlgmr.msra.gmra.mrb[18].mxu0 %vm60_vm0, %v2391_v62 }
 0xa88   :  { %v2394_v4 = vpop.f32.mrb[16].mxu0  ;;  %v2399_v5 = vpop.f32.mrb[30].mxu1  ;;  %2568 = vmatpush3.bf16.msra.mxu0 %v2565_v50 }
 0xa89   :  { %v1512_v6 = vpop.f32.mrb[17].mxu0  ;;  %v1599_v38 = vpop.f32.mrb[31].mxu1  ;;  %2570 = vmatprep.subr.bf16.mxu0 %v2569_v2 }
 0xa8a   :  { %2414 = vmatprep.mubr.msk.f32.mxu0 %vm60_vm0, %v1512_v6 }
 0xa8b   :  { %2415 = vmatmul.mubr.msk.f32.gmra.mrb[20].mxu0 %vm60_vm0, %v2394_v4 }
 0xa8c   :  { %2417 = vmatprep.mubr.msk.f32.mxu0 %vm60_vm0, %v1599_v38  ;;  %v2402_v7 = vpop.f32.mrb[32].mxu1  ;;  %2572 = vmatpush3.bf16.msra.mxu0 %v2569_v2 }
 0xa8d   :  { %v1609_v8 = vpop.f32.mrb[33].mxu1 }
 0xa8f   :  { %2418 = vmatmul.mubr.msk.f32.gmra.mrb[22].mxu0 %vm60_vm0, %v2399_v5 }
 0xa90   :  { %2420 = vmatprep.mubr.msk.f32.mxu0 %vm60_vm0, %v1609_v8 }
 0xa93   :  { %2421 = vmatmul.mubr.msk.f32.gmra.mrb[24].mxu0 %vm60_vm0, %v2402_v7 }
 0xa94   :  { %2431 = vmatprep.mubr.msk.f32.mxu0 %vm60_vm0, %v1300_v55 }
 0xa97   :  { %2432 = vmatmul.mubr.msk.f32.vlgmr.msra.gmra.mrb[18].mxu0 %vm60_vm0, %v2375_v54 }
 0xa98   :  { %2434 = vmatprep.mubr.msk.f32.mxu0 %vm60_vm0, %v1310_v58 }
 0xa9b   :  { %2435 = vmatmul.mubr.msk.f32.gmra.mrb[20].mxu0 %vm60_vm0, %v2378_v56 }
 0xa9c   :  { %2437 = vmatprep.mubr.msk.f32.mxu0 %vm60_vm0, %v1397_v59 }
 0xa9f   :  { %2438 = vmatmul.mubr.msk.f32.gmra.mrb[22].mxu0 %vm60_vm0, %v2383_v57 }
 0xaa0   :  { %2440 = vmatprep.mubr.msk.f32.mxu0 %vm60_vm0, %v1407_v1 }
 0xaa3   :  { %2441 = vmatmul.mubr.msk.f32.gmra.mrb[24].mxu0 %vm60_vm0, %v2386_v63 }
 0xb6a   :  { %v2433_v13 = vpop.f32.mrb[18].mxu0 }
 0xb6b   :  { %v1892_v21 = vadd.f32 %v2433_v13, %v2106_v12  ;;  %v1845_v14 = vpop.f32.mrb[19].mxu0 }
 0xb6c   :  { %v1891_v18 = vadd.f32 %v2106_v12, %v1845_v14 }
 0xb6d   :  { %v1900_v3 = vmax.f32 %v1892_v21, 0.0 }
 0xb6e   :  { %v1899_v15 = vmax.f32 %v1891_v18, 0.0  ;;  %v2436_v16 = vpop.f32.mrb[20].mxu0 }
 0xb6f   :  { %v1894_v17 = vadd.f32 %v2436_v16, %v2106_v12  ;;  %v1855_v20 = vpop.f32.mrb[21].mxu0 }
 0xb70   :  { %v1893_v23 = vadd.f32 %v2106_v12, %v1855_v20  ;;  %2451 = vmatprep.mubr.msk.f32.mxu1 %vm60_vm0, %v1899_v15 }
 0xb71   :  { %2452 = vmatmul.mubr.msk.f32.vlgmr.msra.gmra.mrb[34].mxu1 %vm60_vm0, %v1900_v3  ;;  %v1902_v22 = vmax.f32 %v1894_v17, 0.0 }
 0xb72   :  { %v1901_v24 = vmax.f32 %v1893_v23, 0.0  ;;  %v2439_v25 = vpop.f32.mrb[22].mxu0 }
 0xb73   :  { %v1896_v26 = vadd.f32 %v2439_v25, %v2106_v12  ;;  %v1865_v27 = vpop.f32.mrb[23].mxu0 }
 0xb74   :  { %v1895_v28 = vadd.f32 %v2106_v12, %v1865_v27  ;;  %2454 = vmatprep.mubr.msk.f32.mxu1 %vm60_vm0, %v1901_v24 }
 0xb75   :  { %2455 = vmatmul.mubr.msk.f32.gmra.mrb[36].mxu1 %vm60_vm0, %v1902_v22  ;;  %v1904_v30 = vmax.f32 %v1896_v26, 0.0 }
 0xb76   :  { %v1903_v19 = vmax.f32 %v1895_v28, 0.0  ;;  %v2442_v29 = vpop.f32.mrb[24].mxu0 }
 0xb77   :  { %v1898_v31 = vadd.f32 %v2442_v29, %v2106_v12  ;;  %v1875_v32 = vpop.f32.mrb[25].mxu0 }
 0xb78   :  { %v1897_v33 = vadd.f32 %v2106_v12, %v1875_v32  ;;  %2457 = vmatprep.mubr.msk.f32.mxu1 %vm60_vm0, %v1903_v19 }
 0xb79   :  { %2458 = vmatmul.mubr.msk.f32.gmra.mrb[38].mxu1 %vm60_vm0, %v1904_v30  ;;  %v1906_v35 = vmax.f32 %v1898_v31, 0.0 }
 0xb7a   :  { %v1905_v34 = vmax.f32 %v1897_v33, 0.0 }
 0xb7c   :  { %2460 = vmatprep.mubr.msk.f32.mxu1 %vm60_vm0, %v1905_v34 }
 0xb7d   :  { %2461 = vmatmul.mubr.msk.f32.gmra.mrb[40].mxu1 %vm60_vm0, %v1906_v35 }
 0xc44   :  { %v2453_v36 = vpop.f32.mrb[34].mxu1 }
 0xc45   :  { %2041 = vst [vmem:[%s3099_s13 + $0x8] sm:$0xff] %v2453_v36  ;;  %v2001_v37 = vpop.f32.mrb[35].mxu1 }
 0xc46   :  { %2040 = vst [vmem:[%s3099_s13] sm:$0xff] %v2001_v37 }
 0xc48   :  { %v2456_v39 = vpop.f32.mrb[36].mxu1 }
 0xc49   :  { %2043 = vst [vmem:[%s3099_s13 + $0x18] sm:$0xff] %v2456_v39  ;;  %v2011_v40 = vpop.f32.mrb[37].mxu1 }
 0xc4a   :  { %2042 = vst [vmem:[%s3099_s13 + $0x10] sm:$0xff] %v2011_v40 }
 0xc4c   :  { %v2459_v41 = vpop.f32.mrb[38].mxu1 }
 0xc4d   :  { %2045 = vst [vmem:[%s3099_s13 + $0x28] sm:$0xff] %v2459_v41  ;;  %v2021_v42 = vpop.f32.mrb[39].mxu1 }
 0xc4e   :  { %2044 = vst [vmem:[%s3099_s13 + $0x20] sm:$0xff] %v2021_v42 }
 0xc50   :  { %v2462_v43 = vpop.f32.mrb[40].mxu1 }
 0xc51   :  { %2047 = vst [vmem:[%s3099_s13 + $0x38] sm:$0xff] %v2462_v43  ;;  %v2031_v44 = vpop.f32.mrb[41].mxu1 }
 0xc52   :  { %2046 = vst [vmem:[%s3099_s13 + $0x30] sm:$0xff] %v2031_v44 }

</bundles_post_ra>
